<compile_context>
chip_gen: v5e
topology: v5e:2x2
jax: 0.10.0
libtpu: 0.0.40
codegen_flags: <defaults>
</compile_context>

<pallas_src>
import jax
import jax.numpy as jnp
from jax import lax
from jax.experimental import pallas as pl
from jax.experimental.pallas import tpu as pltpu

NUM_GROUPS = 32
EPS = 1e-6


def attn_block_kernel(x_ref, wq_ref, wk_ref, wv_ref, wp_ref,
                      bq_ref, bk_ref, bv_ref, bp_ref, o_ref):
    _, C, N = x_ref.shape
    G = NUM_GROUPS
    Cg = C // G
    inv_gn = 1.0 / (Cg * N)

    # ---- GroupNorm(32, C, eps=1e-6): single-pass stats (sum, sum of squares);
    # group pooling only on tiny (C,1)/(G,1,1) arrays.  gamma/beta and the
    # C**-0.5 score scale are folded into the weights on the host, so only the
    # plain normalization happens here.
    x = x_ref[0]                                              # (C, N) f32
    ch_sum = jnp.sum(x, axis=-1, keepdims=True)               # (C, 1)
    ch_sq = jnp.sum(x * x, axis=-1, keepdims=True)            # (C, 1)
    if Cg == 1:
        mean = ch_sum * (1.0 / N)
        ex2 = ch_sq * (1.0 / N)
    else:
        gsum = jnp.sum(ch_sum.reshape(G, Cg, 1), axis=1, keepdims=True)
        gsq = jnp.sum(ch_sq.reshape(G, Cg, 1), axis=1, keepdims=True)
        mean = jnp.broadcast_to(gsum * inv_gn, (G, Cg, 1)).reshape(C, 1)
        ex2 = jnp.broadcast_to(gsq * inv_gn, (G, Cg, 1)).reshape(C, 1)
    var = jnp.maximum(ex2 - mean * mean, 0.0)
    rstd = lax.rsqrt(var + EPS)                               # (C, 1)
    hn = (x - mean) * rstd                                    # (C, N) f32; x dead after this
    h16 = hn.astype(jnp.bfloat16)                             # (C, N) bf16; hn dead after this
    # Per-channel row-sums of hn, derived from the stats (no extra reduction).
    s = (ch_sum - mean * float(N)) * rstd                     # (C, 1) f32

    wq = wq_ref[...]                                          # (C, C) f32 (scale+affine folded)
    wk = wk_ref[...]                                          # (C, C) f32 (affine folded)
    wv = wv_ref[...]                                          # (C, C) f32 (affine folded)
    wp = wp_ref[...]                                          # (C, C) f32
    bq = bq_ref[...]                                          # (C, 1) f32
    bk = bk_ref[...]
    bv = bv_ref[...]
    bp = bp_ref[...]

    # ---- scores = (q @ k^T) * C**-0.5, reassociated through the h-gram:
    #   scores = Wq G Wk^T + (Wq s + N bq) bk^T + bq (Wk s)^T,   G = h h^T
    # One (C,C,N) contraction on the MXU (bf16, f32 acc); the small (C,C)
    # matmuls and the rank-1/rank-2 bias corrections stay in f32.
    gram = lax.dot_general(h16, h16, (((1,), (1,)), ((), ())),
                           preferred_element_type=jnp.float32)            # (C, C)
    t = jnp.dot(wq, gram, preferred_element_type=jnp.float32)             # (C, C)
    scores = lax.dot_general(t, wk, (((1,), (1,)), ((), ())),
                             preferred_element_type=jnp.float32)          # (C, C)
    u1 = jnp.dot(wq, s, preferred_element_type=jnp.float32) + float(N) * bq   # (C, 1)
    u2 = jnp.dot(wk, s, preferred_element_type=jnp.float32)                   # (C, 1)
    lhs2 = jnp.concatenate([u1, bq], axis=1)                               # (C, 2)
    rhs2 = jnp.concatenate([bk, u2], axis=1)                               # (C, 2)
    scores = scores + lax.dot_general(lhs2, rhs2, (((1,), (1,)), ((), ())),
                                      preferred_element_type=jnp.float32)  # exact bias terms

    # ---- softmax over channels (f32 math, EUP reciprocal).
    scores = scores - jnp.max(scores, axis=-1, keepdims=True)
    p = jnp.exp(scores)
    p = p * pl.reciprocal(jnp.sum(p, axis=-1, keepdims=True), approx=True)

    # ---- output projection, reassociated: Wp (p @ v) == ((Wp p) Wv) h + vec.
    m1 = jnp.dot(wp, p, preferred_element_type=jnp.float32)                # (C, C)
    m2 = jnp.dot(m1, wv, preferred_element_type=jnp.float32)               # (C, C)
    vec = jnp.dot(m1, bv, preferred_element_type=jnp.float32) + bp         # (C, 1)
    proj = jnp.dot(m2.astype(jnp.bfloat16), h16,
                   preferred_element_type=jnp.float32)                     # (C, N)

    # Residual: re-read x right before the add so it is not live across the
    # matmuls above.
    o_ref[0] = (x_ref[0] + proj + vec).astype(o_ref.dtype)


def _vmem_limit_bytes(C, N):
    """Size the scoped VMEM limit from the real footprint, capped by hardware."""
    blk = C * N * 4                                  # one f32 (C, N) image block
    pipe = 4 * blk                                   # x + out, double-buffered
    weights = 2 * (4 * C * C + 8 * C) * 4            # resident f32 weights/biases (x2 slack)
    interm = 2 * blk + C * N * 2 + 8 * C * C * 4     # hn/proj f32, h16, (C,C) temps
    need = int((pipe + weights + interm) * 1.25) + (2 << 20)
    try:
        cap = pltpu.get_tpu_info().vmem_capacity_bytes
    except Exception:
        cap = 64 << 20                               # conservative (v7x per-TC)
    return min(max(need, 32 << 20), int(cap * 0.9))


def attn_block(x, params):
    """x: (B, C, H, W) float32 (NCHW, matching the PyTorch module)."""
    B, C, H, W = x.shape
    assert C % NUM_GROUPS == 0, (C, NUM_GROUPS)
    N = H * W
    xf = x.reshape(B, C, N)

    gamma = params["gamma"].astype(jnp.float32)
    beta = params["beta"].astype(jnp.float32)
    scale = float(C) ** -0.5

    # Fold the GroupNorm affine into the 1x1-conv projections (host side, once):
    #   conv(hn*gamma + beta) = (W * gamma) hn + (W @ beta + b)
    def fold(w, b):
        return w * gamma[None, :], w @ beta + b

    wq, bq = fold(params["wq"], params["bq"])
    wk, bk = fold(params["wk"], params["bk"])
    wv, bv = fold(params["wv"], params["bv"])
    wq = wq * scale          # fold the C**-0.5 score scale into q as well
    bq = bq * scale
    wp, bp = params["wp"], params["bp"]

    mat = lambda w: w.astype(jnp.float32)
    col = lambda b: b.reshape(C, 1).astype(jnp.float32)

    x_spec = pl.BlockSpec((1, C, N), lambda i: (i, 0, 0))
    w_spec = pl.BlockSpec((C, C), lambda i: (0, 0))
    b_spec = pl.BlockSpec((C, 1), lambda i: (0, 0))

    out = pl.pallas_call(
        attn_block_kernel,
        out_shape=jax.ShapeDtypeStruct((B, C, N), x.dtype),
        grid_spec=pltpu.PrefetchScalarGridSpec(
            num_scalar_prefetch=0,
            grid=(B,),
            in_specs=[x_spec,
                      w_spec, w_spec, w_spec, w_spec,
                      b_spec, b_spec, b_spec, b_spec],
            out_specs=x_spec,
        ),
        compiler_params=pltpu.CompilerParams(
            dimension_semantics=("parallel",),
            vmem_limit_bytes=_vmem_limit_bytes(C, N)),
    )(xf, mat(wq), mat(wk), mat(wv), mat(wp),
      col(bq), col(bk), col(bv), col(bp))
    return out.reshape(B, C, H, W)


def ref_forward(x, params):
    """Pure-JAX f32 reference mirroring the PyTorch forward (channel attention)."""
    B, C, H, W = x.shape
    xg = x.reshape(B, NUM_GROUPS, C // NUM_GROUPS, H, W)
    mean = xg.mean(axis=(2, 3, 4), keepdims=True)
    var = ((xg - mean) ** 2).mean(axis=(2, 3, 4), keepdims=True)
    hn = ((xg - mean) / jnp.sqrt(var + EPS)).reshape(B, C, H, W)
    h = hn * params["gamma"][None, :, None, None] + params["beta"][None, :, None, None]
    hf = h.reshape(B, C, H * W)
    q = jnp.einsum("oc,bcn->bon", params["wq"], hf) + params["bq"][None, :, None]
    k = jnp.einsum("oc,bcn->bon", params["wk"], hf) + params["bk"][None, :, None]
    v = jnp.einsum("oc,bcn->bon", params["wv"], hf) + params["bv"][None, :, None]
    scores = jnp.einsum("bcn,bdn->bcd", q, k) * (float(C) ** -0.5)
    p = jax.nn.softmax(scores, axis=-1)
    attn = jnp.einsum("bcd,bdn->bcn", p, v)
    proj = jnp.einsum("oc,bcn->bon", params["wp"], attn) + params["bp"][None, :, None]
    return x + proj.reshape(B, C, H, W)


def init_params(key, channels):
    C = channels
    ks = jax.random.split(key, 10)
    scale = float(C) ** -0.5
    u = lambda k, shape: jax.random.uniform(k, shape, jnp.float32, -scale, scale)
    return {
        # non-trivial affine so the host-side folding is actually exercised
        "gamma": 1.0 + 0.1 * jax.random.normal(ks[8], (C,), jnp.float32),
        "beta": 0.1 * jax.random.normal(ks[9], (C,), jnp.float32),
        "wq": u(ks[0], (C, C)), "bq": u(ks[1], (C,)),
        "wk": u(ks[2], (C, C)), "bk": u(ks[3], (C,)),
        "wv": u(ks[4], (C, C)), "bv": u(ks[5], (C,)),
        "wp": u(ks[6], (C, C)), "bp": u(ks[7], (C,)),
    }


if __name__ == "__main__":
    # GroupNorm(num_groups=32) requires channels % 32 == 0 -> smallest C is 32.
    B, C, H, W = 2, 32, 16, 16
    key = jax.random.PRNGKey(0)
    kx, kp = jax.random.split(key)
    x = jax.random.normal(kx, (B, C, H, W), jnp.float32)
    params = init_params(kp, C)

    out = jax.block_until_ready(attn_block(x, params))
    ref = ref_forward(x, params)

    assert out.shape == (B, C, H, W)
    err = float(jnp.max(jnp.abs(out - ref)))
    # bf16 MXU operands on the two C^2*N contractions + approx EUP reciprocal
    # vs a pure-f32 reference -> relaxed absolute tolerance (documented).
    assert err < 3e-2, err
    print("KERNEL_OK")
</pallas_src>

<mosaic_0001>
module attributes {stable_mosaic.version = 11 : i64} {
  func.func @attn_block_kernel(%arg0: i32, %arg1: memref<1x32x256xf32, #tpu.memory_space<vmem>>, %arg2: memref<32x32xf32, #tpu.memory_space<vmem>>, %arg3: memref<32x32xf32, #tpu.memory_space<vmem>>, %arg4: memref<32x32xf32, #tpu.memory_space<vmem>>, %arg5: memref<32x32xf32, #tpu.memory_space<vmem>>, %arg6: memref<32x1xf32, #tpu.memory_space<vmem>>, %arg7: memref<32x1xf32, #tpu.memory_space<vmem>>, %arg8: memref<32x1xf32, #tpu.memory_space<vmem>>, %arg9: memref<32x1xf32, #tpu.memory_space<vmem>>, %arg10: memref<1x32x256xf32, #tpu.memory_space<vmem>>) attributes {dimension_semantics = [#tpu.dimension_semantics<parallel>], iteration_bounds = array<i64: 2>, scalar_prefetch = 0 : i64, scratch_operands = 0 : i64, tpu.core_type = #tpu.core_type<tc>, window_params = [{transform_indices = @transform_0, window_bounds = array<i64: 1, 32, 256>}, {pipeline_mode = #tpu.pipeline_mode<synchronous>, transform_indices = @transform_1, window_bounds = array<i64: 32, 32>}, {pipeline_mode = #tpu.pipeline_mode<synchronous>, transform_indices = @transform_2, window_bounds = array<i64: 32, 32>}, {pipeline_mode = #tpu.pipeline_mode<synchronous>, transform_indices = @transform_3, window_bounds = array<i64: 32, 32>}, {pipeline_mode = #tpu.pipeline_mode<synchronous>, transform_indices = @transform_4, window_bounds = array<i64: 32, 32>}, {pipeline_mode = #tpu.pipeline_mode<synchronous>, transform_indices = @transform_5, window_bounds = array<i64: 32, 1>}, {pipeline_mode = #tpu.pipeline_mode<synchronous>, transform_indices = @transform_6, window_bounds = array<i64: 32, 1>}, {pipeline_mode = #tpu.pipeline_mode<synchronous>, transform_indices = @transform_7, window_bounds = array<i64: 32, 1>}, {pipeline_mode = #tpu.pipeline_mode<synchronous>, transform_indices = @transform_8, window_bounds = array<i64: 32, 1>}, {transform_indices = @transform_9, window_bounds = array<i64: 1, 32, 256>}]} {
    %c0 = arith.constant 0 : index
    %c0_0 = arith.constant 0 : index
    %c0_1 = arith.constant 0 : index
    %0 = vector.load %arg1[%c0, %c0_0, %c0_1] : memref<1x32x256xf32, #tpu.memory_space<vmem>>, vector<1x32x256xf32>
    %1 = vector.shape_cast %0 : vector<1x32x256xf32> to vector<32x256xf32>
    %cst = arith.constant dense<0.000000e+00> : vector<32xf32>
    %2 = vector.multi_reduction <add>, %1, %cst [1] : vector<32x256xf32> to vector<32xf32>
    %3 = vector.shape_cast %2 : vector<32xf32> to vector<32x1xf32>
    %4 = arith.mulf %1, %1 : vector<32x256xf32>
    %cst_2 = arith.constant dense<0.000000e+00> : vector<32xf32>
    %5 = vector.multi_reduction <add>, %4, %cst_2 [1] : vector<32x256xf32> to vector<32xf32>
    %6 = vector.shape_cast %5 : vector<32xf32> to vector<32x1xf32>
    %cst_3 = arith.constant 3.906250e-03 : f32
    %7 = vector.broadcast %cst_3 : f32 to vector<32x1xf32>
    %8 = arith.mulf %3, %7 : vector<32x1xf32>
    %cst_4 = arith.constant 3.906250e-03 : f32
    %9 = vector.broadcast %cst_4 : f32 to vector<32x1xf32>
    %10 = arith.mulf %6, %9 : vector<32x1xf32>
    %11 = arith.mulf %8, %8 : vector<32x1xf32>
    %12 = arith.subf %10, %11 : vector<32x1xf32>
    %cst_5 = arith.constant 0.000000e+00 : f32
    %13 = vector.broadcast %cst_5 : f32 to vector<32x1xf32>
    %14 = arith.maximumf %12, %13 : vector<32x1xf32>
    %cst_6 = arith.constant 9.99999997E-7 : f32
    %15 = vector.broadcast %cst_6 : f32 to vector<32x1xf32>
    %16 = arith.addf %14, %15 : vector<32x1xf32>
    %17 = math.rsqrt %16 : vector<32x1xf32>
    %18 = vector.broadcast %8 : vector<32x1xf32> to vector<32x256xf32>
    %19 = arith.subf %1, %18 : vector<32x256xf32>
    %20 = vector.broadcast %17 : vector<32x1xf32> to vector<32x256xf32>
    %21 = arith.mulf %19, %20 : vector<32x256xf32>
    %22 = arith.truncf %21 : vector<32x256xf32> to vector<32x256xbf16>
    %cst_7 = arith.constant 2.560000e+02 : f32
    %23 = vector.broadcast %cst_7 : f32 to vector<32x1xf32>
    %24 = arith.mulf %8, %23 : vector<32x1xf32>
    %25 = arith.subf %3, %24 : vector<32x1xf32>
    %26 = arith.mulf %25, %17 : vector<32x1xf32>
    %c0_8 = arith.constant 0 : index
    %c0_9 = arith.constant 0 : index
    %27 = vector.load %arg2[%c0_8, %c0_9] : memref<32x32xf32, #tpu.memory_space<vmem>>, vector<32x32xf32>
    %c0_10 = arith.constant 0 : index
    %c0_11 = arith.constant 0 : index
    %28 = vector.load %arg3[%c0_10, %c0_11] : memref<32x32xf32, #tpu.memory_space<vmem>>, vector<32x32xf32>
    %c0_12 = arith.constant 0 : index
    %c0_13 = arith.constant 0 : index
    %29 = vector.load %arg4[%c0_12, %c0_13] : memref<32x32xf32, #tpu.memory_space<vmem>>, vector<32x32xf32>
    %c0_14 = arith.constant 0 : index
    %c0_15 = arith.constant 0 : index
    %30 = vector.load %arg5[%c0_14, %c0_15] : memref<32x32xf32, #tpu.memory_space<vmem>>, vector<32x32xf32>
    %c0_16 = arith.constant 0 : index
    %c0_17 = arith.constant 0 : index
    %31 = vector.load %arg6[%c0_16, %c0_17] : memref<32x1xf32, #tpu.memory_space<vmem>>, vector<32x1xf32>
    %c0_18 = arith.constant 0 : index
    %c0_19 = arith.constant 0 : index
    %32 = vector.load %arg7[%c0_18, %c0_19] : memref<32x1xf32, #tpu.memory_space<vmem>>, vector<32x1xf32>
    %c0_20 = arith.constant 0 : index
    %c0_21 = arith.constant 0 : index
    %33 = vector.load %arg8[%c0_20, %c0_21] : memref<32x1xf32, #tpu.memory_space<vmem>>, vector<32x1xf32>
    %c0_22 = arith.constant 0 : index
    %c0_23 = arith.constant 0 : index
    %34 = vector.load %arg9[%c0_22, %c0_23] : memref<32x1xf32, #tpu.memory_space<vmem>>, vector<32x1xf32>
    %cst_24 = arith.constant dense<0.000000e+00> : vector<32x32xf32>
    %35 = tpu.matmul %22, %22, %cst_24 {dimension_numbers = #tpu.dot_dimension_numbers<[1], [1], [0], [0], [0, 0, 1, 0], [], []>} : vector<32x256xbf16>, vector<32x256xbf16>, vector<32x32xf32> -> vector<32x32xf32>
    %cst_25 = arith.constant dense<0.000000e+00> : vector<32x32xf32>
    %36 = tpu.matmul %27, %35, %cst_25 {dimension_numbers = #tpu.dot_dimension_numbers<[1], [0], [0], [1], [0, 0, 1, 1], [], []>} : vector<32x32xf32>, vector<32x32xf32>, vector<32x32xf32> -> vector<32x32xf32>
    %cst_26 = arith.constant dense<0.000000e+00> : vector<32x32xf32>
    %37 = tpu.matmul %36, %28, %cst_26 {dimension_numbers = #tpu.dot_dimension_numbers<[1], [1], [0], [0], [0, 0, 1, 0], [], []>} : vector<32x32xf32>, vector<32x32xf32>, vector<32x32xf32> -> vector<32x32xf32>
    %cst_27 = arith.constant dense<0.000000e+00> : vector<32x1xf32>
    %38 = tpu.matmul %27, %26, %cst_27 {dimension_numbers = #tpu.dot_dimension_numbers<[1], [0], [0], [1], [0, 0, 1, 1], [], []>} : vector<32x32xf32>, vector<32x1xf32>, vector<32x1xf32> -> vector<32x1xf32>
    %cst_28 = arith.constant 2.560000e+02 : f32
    %39 = vector.broadcast %cst_28 : f32 to vector<32x1xf32>
    %40 = arith.mulf %39, %31 : vector<32x1xf32>
    %41 = arith.addf %38, %40 : vector<32x1xf32>
    %cst_29 = arith.constant dense<0.000000e+00> : vector<32x1xf32>
    %42 = tpu.matmul %28, %26, %cst_29 {dimension_numbers = #tpu.dot_dimension_numbers<[1], [0], [0], [1], [0, 0, 1, 1], [], []>} : vector<32x32xf32>, vector<32x1xf32>, vector<32x1xf32> -> vector<32x1xf32>
    %43 = tpu.concatenate %41, %31 in 1 : vector<32x1xf32>, vector<32x1xf32> -> vector<32x2xf32>
    %44 = tpu.concatenate %32, %42 in 1 : vector<32x1xf32>, vector<32x1xf32> -> vector<32x2xf32>
    %cst_30 = arith.constant dense<0.000000e+00> : vector<32x32xf32>
    %45 = tpu.matmul %43, %44, %cst_30 {dimension_numbers = #tpu.dot_dimension_numbers<[1], [1], [0], [0], [0, 0, 1, 0], [], []>} : vector<32x2xf32>, vector<32x2xf32>, vector<32x32xf32> -> vector<32x32xf32>
    %46 = arith.addf %37, %45 : vector<32x32xf32>
    %cst_31 = arith.constant dense<0xFF800000> : vector<32xf32>
    %47 = vector.multi_reduction <maximumf>, %46, %cst_31 [1] : vector<32x32xf32> to vector<32xf32>
    %48 = vector.shape_cast %47 : vector<32xf32> to vector<32x1xf32>
    %49 = vector.broadcast %48 : vector<32x1xf32> to vector<32x32xf32>
    %50 = arith.subf %46, %49 : vector<32x32xf32>
    %51 = math.exp %50 : vector<32x32xf32>
    %cst_32 = arith.constant dense<0.000000e+00> : vector<32xf32>
    %52 = vector.multi_reduction <add>, %51, %cst_32 [1] : vector<32x32xf32> to vector<32xf32>
    %53 = vector.shape_cast %52 : vector<32xf32> to vector<32x1xf32>
    %54 = tpu.reciprocal %53 {approx = true} : vector<32x1xf32> -> vector<32x1xf32>
    %55 = vector.broadcast %54 : vector<32x1xf32> to vector<32x32xf32>
    %56 = arith.mulf %51, %55 : vector<32x32xf32>
    %cst_33 = arith.constant dense<0.000000e+00> : vector<32x32xf32>
    %57 = tpu.matmul %30, %56, %cst_33 {dimension_numbers = #tpu.dot_dimension_numbers<[1], [0], [0], [1], [0, 0, 1, 1], [], []>} : vector<32x32xf32>, vector<32x32xf32>, vector<32x32xf32> -> vector<32x32xf32>
    %cst_34 = arith.constant dense<0.000000e+00> : vector<32x32xf32>
    %58 = tpu.matmul %57, %29, %cst_34 {dimension_numbers = #tpu.dot_dimension_numbers<[1], [0], [0], [1], [0, 0, 1, 1], [], []>} : vector<32x32xf32>, vector<32x32xf32>, vector<32x32xf32> -> vector<32x32xf32>
    %cst_35 = arith.constant dense<0.000000e+00> : vector<32x1xf32>
    %59 = tpu.matmul %57, %33, %cst_35 {dimension_numbers = #tpu.dot_dimension_numbers<[1], [0], [0], [1], [0, 0, 1, 1], [], []>} : vector<32x32xf32>, vector<32x1xf32>, vector<32x1xf32> -> vector<32x1xf32>
    %60 = arith.addf %59, %34 : vector<32x1xf32>
    %61 = arith.truncf %58 : vector<32x32xf32> to vector<32x32xbf16>
    %cst_36 = arith.constant dense<0.000000e+00> : vector<32x256xf32>
    %62 = tpu.matmul %61, %22, %cst_36 {dimension_numbers = #tpu.dot_dimension_numbers<[1], [0], [0], [1], [0, 0, 1, 1], [], []>} : vector<32x32xbf16>, vector<32x256xbf16>, vector<32x256xf32> -> vector<32x256xf32>
    %c0_37 = arith.constant 0 : index
    %c0_38 = arith.constant 0 : index
    %c0_39 = arith.constant 0 : index
    %63 = vector.load %arg1[%c0_37, %c0_38, %c0_39] : memref<1x32x256xf32, #tpu.memory_space<vmem>>, vector<1x32x256xf32>
    %64 = vector.shape_cast %63 : vector<1x32x256xf32> to vector<32x256xf32>
    %65 = arith.addf %64, %62 : vector<32x256xf32>
    %66 = vector.broadcast %60 : vector<32x1xf32> to vector<32x256xf32>
    %67 = arith.addf %65, %66 : vector<32x256xf32>
    %c0_40 = arith.constant 0 : index
    %c0_41 = arith.constant 0 : index
    %c0_42 = arith.constant 0 : index
    %68 = vector.load %arg10[%c0_40, %c0_41, %c0_42] : memref<1x32x256xf32, #tpu.memory_space<vmem>>, vector<1x32x256xf32>
    %69 = vector.shape_cast %68 : vector<1x32x256xf32> to vector<32x256xf32>
    %70 = vector.shape_cast %67 : vector<32x256xf32> to vector<1x32x256xf32>
    tpu.vector_store %arg10[%c0_40, %c0_41, %c0_42], %70 {strides = array<i32>} : memref<1x32x256xf32, #tpu.memory_space<vmem>>, vector<1x32x256xf32>,
    return
  }
  func.func @transform_0(%arg0: i32) -> (i32, i32, i32) {
    %c0_i32 = arith.constant 0 : i32
    %c0_i32_0 = arith.constant 0 : i32
    %c0_i32_1 = arith.constant 0 : i32
    return %arg0, %c0_i32, %c0_i32_0 : i32, i32, i32
  }
  func.func @transform_1(%arg0: i32) -> (i32, i32) {
    %c0_i32 = arith.constant 0 : i32
    %c0_i32_0 = arith.constant 0 : i32
    %c0_i32_1 = arith.constant 0 : i32
    return %c0_i32, %c0_i32_0 : i32, i32
  }
  func.func @transform_2(%arg0: i32) -> (i32, i32) {
    %c0_i32 = arith.constant 0 : i32
    %c0_i32_0 = arith.constant 0 : i32
    %c0_i32_1 = arith.constant 0 : i32
    return %c0_i32, %c0_i32_0 : i32, i32
  }
  func.func @transform_3(%arg0: i32) -> (i32, i32) {
    %c0_i32 = arith.constant 0 : i32
    %c0_i32_0 = arith.constant 0 : i32
    %c0_i32_1 = arith.constant 0 : i32
    return %c0_i32, %c0_i32_0 : i32, i32
  }
  func.func @transform_4(%arg0: i32) -> (i32, i32) {
    %c0_i32 = arith.constant 0 : i32
    %c0_i32_0 = arith.constant 0 : i32
    %c0_i32_1 = arith.constant 0 : i32
    return %c0_i32, %c0_i32_0 : i32, i32
  }
  func.func @transform_5(%arg0: i32) -> (i32, i32) {
    %c0_i32 = arith.constant 0 : i32
    %c0_i32_0 = arith.constant 0 : i32
    %c0_i32_1 = arith.constant 0 : i32
    return %c0_i32, %c0_i32_0 : i32, i32
  }
  func.func @transform_6(%arg0: i32) -> (i32, i32) {
    %c0_i32 = arith.constant 0 : i32
    %c0_i32_0 = arith.constant 0 : i32
    %c0_i32_1 = arith.constant 0 : i32
    return %c0_i32, %c0_i32_0 : i32, i32
  }
  func.func @transform_7(%arg0: i32) -> (i32, i32) {
    %c0_i32 = arith.constant 0 : i32
    %c0_i32_0 = arith.constant 0 : i32
    %c0_i32_1 = arith.constant 0 : i32
    return %c0_i32, %c0_i32_0 : i32, i32
  }
  func.func @transform_8(%arg0: i32) -> (i32, i32) {
    %c0_i32 = arith.constant 0 : i32
    %c0_i32_0 = arith.constant 0 : i32
    %c0_i32_1 = arith.constant 0 : i32
    return %c0_i32, %c0_i32_0 : i32, i32
  }
  func.func @transform_9(%arg0: i32) -> (i32, i32, i32) {
    %c0_i32 = arith.constant 0 : i32
    %c0_i32_0 = arith.constant 0 : i32
    %c0_i32_1 = arith.constant 0 : i32
    return %arg0, %c0_i32, %c0_i32_0 : i32, i32, i32
  }
}

</mosaic_0001>

<bundles_post_ra>
// kernel: tpu_custom_call.1
= control target key start
LH: loop header
LB: loop body
LE: loop exit
PB: predicated region body
PF: predicated region fallthrough
CT: control target
= control target key end

     0   :  { %14 = vsyncpa [#allocation3], 0  ;;  %s1856_s0 = inlined_call_operand.hbm [shape: f32[2,32,256], index: 0, kind: input, shape index: {}]   ;;  %s1857_s1 = inlined_call_operand.vmem [shape: f32[32,32], index: 1, kind: input, shape index: {}]   ;;  %s1858_s2 = inlined_call_operand.vmem [shape: f32[32,32], index: 2, kind: input, shape index: {}]   ;;  %s1859_s3 = inlined_call_operand.vmem [shape: f32[32,32], index: 3, kind: input, shape index: {}]   ;;  %s1860_s4 = inlined_call_operand.vmem [shape: f32[32,32], index: 4, kind: input, shape index: {}]   ;;  %s1861_s5 = inlined_call_operand.vmem [shape: f32[32,1], index: 5, kind: input, shape index: {}]   ;;  %s1862_s6 = inlined_call_operand.vmem [shape: f32[32,1], index: 6, kind: input, shape index: {}]   ;;  %s1863_s7 = inlined_call_operand.vmem [shape: f32[32,1], index: 7, kind: input, shape index: {}]   ;;  %s1864_s8 = inlined_call_operand.vmem [shape: f32[32,1], index: 8, kind: input, shape index: {}]   ;;  %s1865_s9 = inlined_call_operand.hbm [shape: f32[2,32,256], index: 9, kind: output, shape index: {}]  }
   0x1   :  { %16 = vsyncpa [#allocation3 + $0x1], 0 }
   0x2   :  { %17 = vsyncpa [#allocation4], 0 }
   0x3   :  { %19 = vsyncpa [#allocation4 + $0x1], 0  ;;  %s1439_s30 = smov 0   ;;  %s1441_s10 = smov 0  }
   0x4   :  { %s1443_s11 = smov 0   ;;  %s1445_s12 = smov 0  }
   0x5 LB: > { %1869 = sst [smem:[#allocation8_spill]] %s1377_s11  ;;  %s1460_s13 = sadd.s32 4294967295, %s1381_s12   ;;  %s1381_s12 = sphi %s1445_s12, %s1878_s12   ;;  %s1377_s11 = sphi %s1443_s11, %s1880_s11   ;;  %s1373_s10 = sphi %s1441_s10, %s1882_s10   ;;  %s1369_s30 = sphi %s1439_s30, %s1881_s30  }
   0x6   : > { %s1146_s14 = sadd.s32 4294967294, %s1381_s12   ;;  %s1464_s15 = sadd.s32 1, %s1381_s12  }
   0x7   : > { %1870 = sst [smem:[#allocation9_spill]] %s1464_s15  ;;  %s32_s16 = sadd.s32 1, %s1377_s11 }
   0x8   : > { %s29_s17 = ssub.s32 %s1381_s12, %s1464_s15  ;;  %p39_p0 = scmp.ne.s32.totalorder %s1377_s11, %s1373_s10 }
   0x9   : > { %p30_p1 = scmp.eq.s32.totalorder %s29_s17, 0  ;;  %p40_p2 = scmp.eq.s32.totalorder %s1381_s12, 0 }
   0xa   : > { %p45_p3 = scmp.ne.s32.totalorder %s1373_s10, %s1369_s30  ;;  %p46_p4 = scmp.eq.s32.totalorder %s1460_s13, 0 }
   0xb   : > { %s1476_s18 = scalar_select %p30_p1, %s1377_s11, %s32_s16  }
   0xc   : > { %p1478_p5 = por %p40_p2, %p39_p0  ;;  %p1482_p6 = por %p46_p4, %p45_p3 }
   0xd   : > { %1871 = sst [smem:[#allocation10_spill]] %s1476_s18  ;;  %p237_p7 = scmp.eq.s32.totalorder %s1460_s13, 1 }
   0xe   : > { %p243_p8 = scmp.eq.s32.totalorder %s1146_s14, 1  ;;  %p1218_p10 = scmp.lt.s32.totalorder %s1381_s12, 2 }
   0xf   : > { %p1489_p11 = por %p237_p7, %p39_p0  ;;  %s287_s23 = sand.u32 1, %s1377_s11  }
  0x10   : > { %p1493_p12 = por %p243_p8, %p45_p3  ;;  %s1204_s24 = sshll.u32 %s1381_s12, 6 }
  0x11   : > { %s1149_s25 = sshll.u32 %s287_s23, 6  ;;  %s296_s28 = scalar_lea.hbm %s1856_s0, %s1204_s24 }
  0x12   : > { %s297_s29 = sshll.u32 %s296_s28, 4  ;;  %s291_s14 = scalar_lea.vmem [#allocation2], %s1149_s25  ;;  %s298_s29 = int_to_ptr.hbm [resolvable:$true] %s297_s29 }
  0x13   : > { %s299_s16 = sshll.u32 %s291_s14, 4  ;;  %p1504_p13 = pnand %p1218_p10, %p1478_p5  ;;  %s300_s16 = int_to_ptr.vmem [resolvable:$true] %s299_s16 }
  0x14   : > { %p1152_p0 = scmp.ge.s32.totalorder %s1381_s12, 1  ;;  %p307_p1 = scmp.lt.s32.totalorder %s1381_s12, 3 }
  0x15   : > { %s288_s18 = scalar_lea.sflag [#allocation3], %s287_s23  ;;  %s1285_s11 = sshra.s32 %s298_s29, 4  ;;  %s1286_s11 = int_to_ptr.hbm [resolvable:$true] %s1285_s11 }
  0x16   : > { %s1287_s15 = scalar_lea.hbm %s1286_s11, 64  ;;  %p1289_p3 = pneg %p1504_p13 }
  0x17   : > { %p1288_p2 = scmp.ne.s32.totalorder %s1286_s11, %s1287_s15  ;;  %s1292_s19 = scalar_lea.hbm %s1856_s0, 128 }
  0x18   : > { %p1293_p5 = scmp.lt.s32.totalorder %s1286_s11, %s1856_s0  ;;  %p1294_p8 = scmp.lt.s32.totalorder %s1292_s19, %s1287_s15 }
  0x19   : > { %p1290_p4 = pnand %p1289_p3, %p1288_p2 }
  0x1a   : > { %p1295_p10 = por %p1294_p8, %p1293_p5 }
  0x1b   : > { %p1291_p7 = pneg %p1290_p4 }
  0x1d   : > { %p1296_p9 = pnand %p1295_p10, %p1291_p7 }
  0x1f   : > { %1299 = shalt.err (!%p1296_p9)
}
  0x20   : > { %s1383_s23 = smov 256   ;;  %s1384_s28 = smov 16  }
  0x21   : > { %1213 = dma.hbm_to_vmem [thread:$0]  (!%p1504_p13), %s298_s29, 1024, %s300_s16, %s288_s18, %s1383_s23, %s1383_s23, %s1384_s28  }
  0x22   : > { %p308_p2 = pnand %p1152_p0, %p307_p1 }
  0x23   : > { %s1525_s14 = sand.u32 (!%p308_p2), 1, %s1373_s10  }
  0x24   : > { %311 = sbr.rel (%p308_p2) target bundleno = 1531 (0x5fb), region = 56  ;;  %s1153_s11 = sshll.u32 (!%p308_p2), %s1525_s14, 6 }
  0x25   : > { %s314_s15 = scalar_lea.sflag (!%p308_p2), [#allocation3], %s1525_s14  ;;  %s317_s24 = scalar_lea.vmem (!%p308_p2), [#allocation2], %s1153_s11 }
  0x29   : > { %1360 = dma.done.wait (%p1482_p6), %s314_s15, 1024  }
  0x2a   : > { %1362 = vsyncadd (%p1482_p6), %s314_s15, 4294966272  ;;  %v1535_v0 = vld [vmem:[%s317_s24 + $0x20] sm:$0xff]  ;;  %v1537_v1 = vld [vmem:[%s317_s24 + $0x28] sm:$0xff]  ;;  %vm560_vm12 = vcmask 261120   ;;  %s1385_s16 = smov 1   ;;  %vm717_vm13 = vcmask 15360  }
  0x2b   : > { %v1539_v2 = vld [vmem:[%s317_s24] sm:$0xff]  ;;  %v368_v3 = vadd.f32 %v1537_v1, %v1535_v0  ;;  %v378_v4 = vmul.f32 %v1535_v0, %v1535_v0  ;;  %v379_v5 = vmul.f32 %v1537_v1, %v1537_v1  ;;  %v1547_v6 = vld [vmem:[%s317_s24 + $0x8] sm:$0xff]  ;;  %v1551_v8 = vld [vmem:[%s317_s24 + $0x30] sm:$0xff]  ;;  %vm692_vm14 = vcmask 7168   ;;  %s1806_s18 = scalar_lea.vmem [#allocation5], %s1153_s11  ;;  %s1205_s11 = sshll.u32 %s1460_s13, 6 }
  0x2c   : > { %v362_v7 = vadd.f32 %v1547_v6, %v1539_v2  ;;  %v1553_v9 = vld [vmem:[%s317_s24 + $0x38] sm:$0xff]  ;;  %v380_v11 = vmul.f32 %v1551_v8, %v1551_v8  ;;  %v1559_v13 = vld [vmem:[%s317_s24 + $0x10] sm:$0xff]  ;;  %v374_v18 = vmul.f32 %v1539_v2, %v1539_v2  ;;  %v375_v19 = vmul.f32 %v1547_v6, %v1547_v6  ;;  %s1070_s17 = sshll.u32 %s1806_s18, 4  ;;  %s1058_s13 = scalar_lea.sflag [#allocation4], %s1525_s14  ;;  %s1071_s17 = int_to_ptr.vmem [resolvable:$true] %s1070_s17 }
  0x2d   : > { %369 = vadd.xlane.f32.xlu0 %v368_v3  ;;  %v388_v10 = vadd.f32 %v379_v5, %v378_v4  ;;  %v381_v12 = vmul.f32 %v1553_v9, %v1553_v9  ;;  %v1561_v14 = vld [vmem:[%s317_s24 + $0x18] sm:$0xff]  ;;  %v371_v15 = vadd.f32 %v1553_v9, %v1551_v8  ;;  %v376_v20 = vmul.f32 %v1559_v13, %v1559_v13  ;;  %s1335_s28 = scalar_lea.hbm %s1865_s9, 128 }
  0x2e   : > { %363 = vadd.xlane.f32.xlu2 %v362_v7  ;;  %v365_v16 = vadd.f32 %v1561_v14, %v1559_v13  ;;  %v377_v21 = vmul.f32 %v1561_v14, %v1561_v14  ;;  %v382_v22 = vadd.f32 %v375_v19, %v374_v18 }
  0x2f   : > { %389 = vadd.xlane.f32.xlu1 %v388_v10  ;;  %v391_v17 = vadd.f32 %v381_v12, %v380_v11 }
  0x30   : > { %v385_v23 = vadd.f32 %v377_v21, %v376_v20 }
  0x35   : > { %372 = vadd.xlane.f32.xlu0 %v371_v15 }
  0x36   : > { %366 = vadd.xlane.f32.xlu2 %v365_v16 }
  0x37   : > { %392 = vadd.xlane.f32.xlu1 %v391_v17 }
  0x3d   : > { %383 = vadd.xlane.f32.xlu0 %v382_v22 }
  0x3f   : > { %386 = vadd.xlane.f32.xlu1 %v385_v23 }
  0xa0   : > { %v1575_v24 = vpop.xlane.xlu0 %369 }
  0xa1   : > { %v1578_v25 = vmul.f32 0.00390625, %v1575_v24  ;;  %v1580_v27 = vpop.xlane.xlu2 %363 }
  0xa2   : > { %v390_v26 = vpop.xlane.xlu1 %389  ;;  %v1594_v40 = vmul.f32 0.00390625, %v1580_v27 }
  0xa3   : > { %v400_v28 = vmul.f32 0.00390625, %v390_v26  ;;  %v404_v29 = vmul.f32 %v1578_v25, %v1578_v25  ;;  %v480_v5 = vmul.f32 256.0, %v1578_v25  ;;  %v462_v17 = vsub.f32 %v1535_v0, %v1578_v25 }
  0xa4   : > { %v402_v46 = vmul.f32 %v1594_v40, %v1594_v40  ;;  %v478_v15 = vmul.f32 256.0, %v1594_v40  ;;  %v463_v21 = vsub.f32 %v1537_v1, %v1578_v25 }
  0xa5   : > { %v408_v30 = vsub.f32 %v400_v28, %v404_v29  ;;  %v484_v22 = vsub.f32 %v1575_v24, %v480_v5  ;;  %v490_v5 = vld [vmem:[%s1857_s1] sm:$0xff] }
  0xa7   : > { %v412_v31 = vmax.f32 %v408_v30, 0.0 }
  0xa8   : > { %v1584_v32 = vpop.xlane.xlu0 %372 }
  0xa9   : > { %v416_v33 = vadd.f32 1e-06, %v412_v31  ;;  %v1587_v34 = vmul.f32 0.00390625, %v1584_v32  ;;  %v1591_v38 = vpop.xlane.xlu2 %366 }
  0xaa   : > { %v393_v35 = vpop.xlane.xlu1 %392  ;;  %v1597_v41 = vmul.f32 0.00390625, %v1591_v38 }
  0xab   : > { %1261 = vrsqrt.f32 %v416_v33  ;;  %v401_v36 = vmul.f32 0.00390625, %v393_v35  ;;  %v405_v37 = vmul.f32 %v1587_v34, %v1587_v34  ;;  %vm444_vm1 = vweird.f32 %v416_v33 }
  0xac   : > { %v403_v47 = vmul.f32 %v1597_v41, %v1597_v41  ;;  %v481_v10 = vmul.f32 256.0, %v1587_v34  ;;  %v479_v23 = vmul.f32 256.0, %v1597_v41  ;;  %v464_v31 = vsub.f32 %v1551_v8, %v1587_v34 }
  0xad   : > { %v409_v39 = vsub.f32 %v401_v36, %v405_v37  ;;  %v465_v25 = vsub.f32 %v1553_v9, %v1587_v34 }
  0xae   : > { %v485_v28 = vsub.f32 %v1584_v32, %v481_v10 }
  0xaf   : > { %v413_v42 = vmax.f32 %v409_v39, 0.0 }
  0xb0   : > { %v384_v43 = vpop.xlane.xlu0 %383 }
  0xb1   : > { %v1262_v44 = vpop.eup %1261  ;;  %v398_v45 = vmul.f32 0.00390625, %v384_v43  ;;  %v417_v49 = vadd.f32 1e-06, %v413_v42 }
  0xb2   : > { %v439_v48 = vmul.f32 %v1262_v44, %v416_v33  ;;  %v387_v50 = vpop.xlane.xlu1 %386  ;;  %vm445_vm0 = vweird.f32 %v1262_v44 }
  0xb3   : > { %v406_v51 = vsub.f32 %v398_v45, %v402_v46  ;;  %v399_v52 = vmul.f32 0.00390625, %v387_v50  ;;  %1263 = vrsqrt.f32 %v417_v49  ;;  %vm446_vm2 = vmor %vm444_vm1, %vm445_vm0  ;;  %vm454_vm4 = vweird.f32 %v417_v49 }
  0xb4   : > { %v440_v53 = vmul.f32 %v1262_v44, %v439_v48  ;;  %v483_v50 = vsub.f32 %v1591_v38, %v479_v23 }
  0xb5   : > { %v410_v54 = vmax.f32 %v406_v51, 0.0  ;;  %v407_v55 = vsub.f32 %v399_v52, %v403_v47  ;;  %v460_v51 = vsub.f32 %v1559_v13, %v1597_v41  ;;  %v459_v52 = vsub.f32 %v1547_v6, %v1594_v40 }
  0xb6   : > { %v441_v56 = vmul.f32 0.5, %v440_v53  ;;  %v461_v53 = vsub.f32 %v1561_v14, %v1597_v41  ;;  %v495_v41 = vld [vmem:[%s1858_s2 + $0x8] sm:$0xff] }
  0xb7   : > { %v414_v57 = vadd.f32 1e-06, %v410_v54  ;;  %v411_v58 = vmax.f32 %v407_v55, 0.0  ;;  %v482_v54 = vsub.f32 %v1580_v27, %v478_v15  ;;  %v496_v27 = vld [vmem:[%s1858_s2 + $0x10] sm:$0xff] }
  0xb8   : > { %v442_v61 = vsub.f32 1.5, %v441_v56 }
  0xb9   : > { %1265 = vrsqrt.f32 %v414_v57  ;;  %v415_v59 = vadd.f32 1e-06, %v411_v58  ;;  %v1264_v60 = vpop.eup %1263  ;;  %vm424_vm7 = vweird.f32 %v414_v57 }
  0xba   : > { %v449_v62 = vmul.f32 %v1264_v60, %v417_v49  ;;  %v443_v3 = vmul.f32 %v1262_v44, %v442_v61  ;;  %vm455_vm3 = vweird.f32 %v1264_v60  ;;  %v458_v49 = vsub.f32 %v1539_v2, %v1594_v40  ;;  %v497_v40 = vld [vmem:[%s1858_s2 + $0x18] sm:$0xff] }
  0xbb   : > { %1267 = vrsqrt.f32 %v415_v59  ;;  %vm456_vm5 = vmor %vm454_vm4, %vm455_vm3  ;;  %vm434_vm10 = vweird.f32 %v415_v59 }
  0xbc   : > { %v450_v63 = vmul.f32 %v1264_v60, %v449_v62  ;;  %v447_v20 = vsel %vm446_vm2, %v1262_v44, %v443_v3 }
  0xbd   : > { %v470_v35 = vmul.f32 %v462_v17, %v447_v20  ;;  %v471_v42 = vmul.f32 %v463_v21, %v447_v20  ;;  %v1619_v43 = vmul.f32 %v484_v22, %v447_v20  ;;  %v493_v20 = vld [vmem:[%s1857_s1 + $0x18] sm:$0xff] }
  0xbe   : > { %v451_v7 = vmul.f32 0.5, %v450_v63  ;;  %v494_v63 = vld [vmem:[%s1858_s2] sm:$0xff] }
  0xbf   : > { %v1266_v4 = vpop.eup %1265 }
  0xc0   : > { %v419_v11 = vmul.f32 %v1266_v4, %v414_v57  ;;  %v452_v16 = vsub.f32 1.5, %v451_v7  ;;  %vm425_vm6 = vweird.f32 %v1266_v4 }
  0xc1   : > { %v1268_v12 = vpop.eup %1267  ;;  %vm426_vm9 = vmor %vm424_vm7, %vm425_vm6 }
  0xc2   : > { %v420_v18 = vmul.f32 %v1266_v4, %v419_v11  ;;  %v429_v19 = vmul.f32 %v1268_v12, %v415_v59  ;;  %v453_v26 = vmul.f32 %v1264_v60, %v452_v16  ;;  %vm435_vm8 = vweird.f32 %v1268_v12  ;;  %v491_v11 = vld [vmem:[%s1857_s1 + $0x8] sm:$0xff]  ;;  %v492_v16 = vld [vmem:[%s1857_s1 + $0x10] sm:$0xff] }
  0xc3   : > { %vm436_vm11 = vmor %vm434_vm10, %vm435_vm8 }
  0xc4   : > { %v421_v29 = vmul.f32 0.5, %v420_v18  ;;  %v430_v30 = vmul.f32 %v1268_v12, %v429_v19  ;;  %v457_v33 = vsel %vm456_vm5, %v1264_v60, %v453_v26 }
  0xc5   : > { %v1617_v37 = vmul.f32 %v485_v28, %v457_v33  ;;  %v472_v39 = vmul.f32 %v464_v31, %v457_v33  ;;  %v473_v32 = vmul.f32 %v465_v25, %v457_v33 }
  0xc6   : > { %v422_v36 = vsub.f32 1.5, %v421_v29  ;;  %v431_v24 = vmul.f32 0.5, %v430_v30 }
  0xc7   : > { %618 = vmatpush.msra.mxu3 %v1617_v37  ;;  %v476_v44 = vpack.c.bf16 %v472_v39, %v470_v35  ;;  %v1623_v47 = vpack.c.bf16 %v473_v32, %v471_v42  ;;  %v508_v35 = vld [vmem:[%s1861_s5 + $0x10] sm:$0xff]  ;;  %v507_v39 = vld [vmem:[%s1861_s5 + $0x8] sm:$0xff]  ;;  %v513_v42 = vld [vmem:[%s1862_s6 + $0x18] sm:$0xff] }
  0xc8   : > { %v432_v45 = vsub.f32 1.5, %v431_v24  ;;  %v423_v46 = vmul.f32 %v1266_v4, %v422_v36  ;;  %v506_v36 = vld [vmem:[%s1861_s5] sm:$0xff] }
  0xc9   : > { %528 = vmatpush.bf16.xpose.msra.mxu0 %v476_v44  ;;  %619 = vmatpush.msra.mxu3 %v1619_v43 }
  0xca   : > { %v433_v34 = vmul.f32 %v1268_v12, %v432_v45  ;;  %v427_v48 = vsel %vm426_vm9, %v1266_v4, %v423_v46  ;;  %547 = vmatpush.bf16.xpose.msra.mxu1 %v1623_v47  ;;  %v512_v45 = vld [vmem:[%s1862_s6 + $0x10] sm:$0xff] }
  0xcb   : > { %v466_v56 = vmul.f32 %v458_v49, %v427_v48  ;;  %v467_v59 = vmul.f32 %v459_v52, %v427_v48  ;;  %v486_v62 = vmul.f32 %v482_v54, %v427_v48  ;;  %v511_v49 = vld [vmem:[%s1862_s6 + $0x8] sm:$0xff]  ;;  %v510_v54 = vld [vmem:[%s1862_s6] sm:$0xff] }
  0xcc   : > { %v437_v55 = vsel %vm436_vm11, %v1268_v12, %v433_v34 }
  0xcd   : > { %v487_v57 = vmul.f32 %v483_v50, %v437_v55  ;;  %v468_v58 = vmul.f32 %v460_v51, %v437_v55  ;;  %v469_v38 = vmul.f32 %v461_v53, %v437_v55  ;;  %v602_v50 = vmul.f32 256.0, %v506_v36 }
  0xcf   : > { %620 = vmatpush.msra.mxu3 %v487_v57  ;;  %v474_v60 = vpack.c.bf16 %v468_v58, %v466_v56  ;;  %v1637_v61 = vpack.c.bf16 %v469_v38, %v467_v59  ;;  %v603_v59 = vmul.f32 256.0, %v507_v39 }
  0xd1   : > { %621 = vmatpush.msra.mxu3 %v486_v62  ;;  %529 = vmatpush.bf16.xpose.msra.mxu0 %v474_v60 }
  0xd2   : > { %548 = vmatpush.bf16.xpose.msra.mxu1 %v1637_v61  ;;  %1159 = vmatmul.msk.f32.vlgmr.msra.gmra.mxu3 %vm560_vm12, %v490_v5 }
  0xd8   : > { %530 = vmatmul.bf16.vlgmr.msra.gmra.mxu0 %v474_v60 }
  0xd9   : > { %1175 = vmatpush.xpose.msk.msrb.mxu0 %vm560_vm12, %v497_v40  ;;  %549 = vmatmul.bf16.vlgmr.msra.gmra.mxu1 %v1637_v61 }
  0xda   : > { %1160 = vmatmul.msk.f32.gmra.mxu3 %vm560_vm12, %v491_v11 }
  0xdd   : > { %1176 = vmatpush.xpose.msk.msrb.mxu0 %vm560_vm12, %v496_v27 }
  0xe1   : > { %1177 = vmatpush.xpose.msk.msrb.mxu0 %vm560_vm12, %v495_v41 }
  0xe2   : > { %1161 = vmatmul.msk.f32.gmra.mxu3 %vm560_vm12, %v492_v16 }
  0xe5   : > { %1178 = vmatpush.xpose.msk.msrb.mxu0 %vm560_vm12, %v494_v63 }
  0xe8   : > { %535 = vmatmul.bf16.gmra.mxu0 %v476_v44 }
  0xe9   : > { %981 = vmatpush.bf16.msra.mxu0 %v476_v44  ;;  %554 = vmatmul.bf16.gmra.mxu1 %v1623_v47 }
  0xea   : > { %1162 = vmatmul.msk.f32.gmra.mxu3 %vm560_vm12, %v493_v20 }
  0xed   : > { %982 = vmatpush.bf16.msra.mxu0 %v474_v60 }
 0x155   : > { %v531_v3 = vpop.f32.mrf.mxu0  ;;  %v623_v44 = vpop.f32.mrf.mxu3 }
 0x156   : > { %v550_v4 = vpop.f32.mrf.mxu1  ;;  %v624_v53 = vadd.f32 %v623_v44, %v602_v50 }
 0x157   : > { %v551_v23 = vadd.f32 %v550_v4, %v531_v3 }
 0x15d   : > { %v533_v7 = vpop.f32.mrf.mxu0  ;;  %v626_v55 = vpop.f32.mrf.mxu3 }
 0x15e   : > { %v552_v10 = vpop.f32.mrf.mxu1  ;;  %v627_v38 = vadd.f32 %v626_v55, %v603_v59 }
 0x15f   : > { %v553_v22 = vadd.f32 %v552_v10, %v533_v7 }
 0x165   : > { %v536_v12 = vpop.f32.mrf.mxu0 }
 0x166   : > { %v555_v15 = vpop.f32.mrf.mxu1 }
 0x167   : > { %v556_v21 = vadd.f32 %v555_v15, %v536_v12 }
 0x16d   : > { %v538_v17 = vpop.f32.mrf.mxu0 }
 0x16e   : > { %v557_v18 = vpop.f32.mrf.mxu1 }
 0x16f   : > { %v558_v19 = vadd.f32 %v557_v18, %v538_v17 }
 0x171   : > { %585 = vmatpush.msra.mxu2 %v558_v19 }
 0x173   : > { %586 = vmatpush.msra.mxu2 %v556_v21 }
 0x175   : > { %587 = vmatpush.msra.mxu2 %v553_v22 }
 0x177   : > { %588 = vmatpush.msra.mxu2 %v551_v23 }
 0x178   : > { %1155 = vmatmul.msk.f32.vlgmr.msra.gmra.mxu2 %vm560_vm12, %v490_v5 }
 0x179   : > { %659 = vmatpush.msrb.mxu2 %v1617_v37  ;;  %v509_v37 = vld [vmem:[%s1861_s5 + $0x18] sm:$0xff] }
 0x17a   : > { %v605_v4 = vmul.f32 256.0, %v509_v37 }
 0x17b   : > { %660 = vmatpush.msrb.mxu2 %v1619_v43 }
 0x17d   : > { %661 = vmatpush.msrb.mxu2 %v487_v57 }
 0x17f   : > { %662 = vmatpush.msrb.mxu2 %v486_v62  ;;  %v629_v62 = vpop.f32.mrf.mxu3 }
 0x180   : > { %1156 = vmatmul.msk.f32.gmra.mxu2 %vm560_vm12, %v491_v11 }
 0x187   : > { %v632_v5 = vpop.f32.mrf.mxu3 }
 0x188   : > { %1157 = vmatmul.msk.f32.gmra.mxu2 %vm560_vm12, %v492_v16  ;;  %v633_v7 = vadd.f32 %v632_v5, %v605_v4 }
 0x190   : > { %1158 = vmatmul.msk.f32.gmra.mxu2 %vm560_vm12, %v493_v20 }
 0x198   : > { %1163 = vmatmul.msk.f32.vlgmr.msrb.gmra.mxu2 %vm560_vm12, %v494_v63 }
 0x1a0   : > { %1164 = vmatmul.msk.f32.gmra.mxu2 %vm560_vm12, %v495_v41 }
 0x1a8   : > { %1165 = vmatmul.msk.f32.gmra.mxu2 %vm560_vm12, %v496_v27  ;;  %v604_v27 = vmul.f32 256.0, %v508_v35 }
 0x1aa   : > { %v630_v41 = vadd.f32 %v629_v62, %v604_v27  ;;  %v501_v27 = vld [vmem:[%s1859_s3 + $0x18] sm:$0xff] }
 0x1ab   : > { %921 = vmatpush.msra.mxu2 %v501_v27 }
 0x1b0   : > { %1166 = vmatmul.msk.f32.gmra.mxu2 %vm560_vm12, %v497_v40 }
 0x1fb   : > { %v590_v26 = vpop.f32.mrf.mxu2 }
 0x1fc   : > { %1179 = vmatmul.msk.f32.vlgmr.msrb.gmra.mxu0 %vm560_vm12, %v590_v26 }
 0x203   : > { %v593_v28 = vpop.f32.mrf.mxu2 }
 0x204   : > { %1180 = vmatmul.msk.f32.gmra.mxu0 %vm560_vm12, %v593_v28 }
 0x20b   : > { %v596_v29 = vpop.f32.mrf.mxu2 }
 0x20c   : > { %1181 = vmatmul.msk.f32.gmra.mxu0 %vm560_vm12, %v596_v29 }
 0x213   : > { %v599_v30 = vpop.f32.mrf.mxu2 }
 0x214   : > { %1182 = vmatmul.msk.f32.gmra.mxu0 %vm560_vm12, %v599_v30 }
 0x21b   : > { %v664_v31 = vpop.f32.mrf.mxu2 }
 0x223   : > { %v667_v33 = vpop.f32.mrf.mxu2 }
 0x224   : > { %703 = vrot.lane.b32.xlu1 %v667_v33, %s1385_s16 }
 0x22b   : > { %v670_v25 = vpop.f32.mrf.mxu2 }
 0x22c   : > { %705 = vrot.lane.b32.xlu0 %v670_v25, %s1385_s16  ;;  %684 = vrot.lane.b32.xlu1 %v508_v35, %s1385_s16 }
 0x233   : > { %v673_v24 = vpop.f32.mrf.mxu2 }
 0x234   : > { %707 = vrot.lane.b32.xlu2 %v673_v24, %s1385_s16  ;;  %680 = vrot.lane.b32.xlu0 %v506_v36, %s1385_s16 }
 0x23c   : > { %701 = vrot.lane.b32.xlu2 %v664_v31, %s1385_s16  ;;  %686 = vrot.lane.b32.xlu0 %v509_v37, %s1385_s16 }
 0x244   : > { %682 = vrot.lane.b32.xlu2 %v507_v39, %s1385_s16  ;;  %s1069_s16 = scalar_lea.hbm %s1865_s9, %s1205_s11 }
 0x245   : > { %s1072_s25 = sshll.u32 %s1069_s16, 4  ;;  %s1073_s25 = int_to_ptr.hbm [resolvable:$true] %s1072_s25 }
 0x246   : > { %s1329_s19 = sshra.s32 %s1073_s25, 4  ;;  %s1330_s19 = int_to_ptr.hbm [resolvable:$true] %s1329_s19 }
 0x247   : > { %s1331_s26 = scalar_lea.hbm %s1330_s19, 64  ;;  %p1336_p0 = scmp.lt.s32.totalorder %s1330_s19, %s1865_s9 }
 0x248   : > { %p1332_p6 = scmp.ne.s32.totalorder %s1330_s19, %s1331_s26  ;;  %p1337_p1 = scmp.lt.s32.totalorder %s1335_s28, %s1331_s26 }
 0x24a   : > { %p1333_p9 = pnand %p1332_p6, %p1489_p11  ;;  %p1338_p3 = por %p1337_p1, %p1336_p0 }
 0x24c   : > { %p1334_p13 = pneg %p1333_p9 }
 0x24e   : > { %p1339_p4 = pnand %p1338_p3, %p1334_p13 }
 0x279   : > { %v800_v12 = vpop.f32.mrf.mxu0 }
 0x281   : > { %v803_v16 = vpop.f32.mrf.mxu0 }
 0x289   : > { %v806_v20 = vpop.f32.mrf.mxu0 }
 0x28e   : > { %v708_v32 = vpop.permute.xlu2 %707 }
 0x28f   : > { %v716_v43 = vsel %vm692_vm14, %v513_v42, %v708_v32 }
 0x290   : > { %1167 = vmatpush.xpose.msk.msrb.mxu3 %vm717_vm13, %v716_v43 }
 0x291   : > { %v809_v26 = vpop.f32.mrf.mxu0 }
 0x296   : > { %v704_v48 = vpop.permute.xlu1 %703  ;;  %v702_v52 = vpop.permute.xlu2 %701 }
 0x297   : > { %v714_v51 = vsel %vm692_vm14, %v511_v49, %v704_v48  ;;  %v713_v57 = vsel %vm692_vm14, %v510_v54, %v702_v52 }
 0x29e   : > { %v706_v46 = vpop.permute.xlu0 %705  ;;  %v683_v60 = vpop.permute.xlu2 %682 }
 0x29f   : > { %v715_v34 = vsel %vm692_vm14, %v512_v45, %v706_v46  ;;  %v694_v40 = vsel %vm692_vm14, %v627_v38, %v683_v60  ;;  %v685_v63 = vpop.permute.xlu1 %684 }
 0x2a0   : > { %1168 = vmatpush.xpose.msk.msrb.mxu3 %vm717_vm13, %v715_v34  ;;  %v695_v3 = vsel %vm692_vm14, %v630_v41, %v685_v63  ;;  %v500_v41 = vld [vmem:[%s1859_s3 + $0x10] sm:$0xff] }
 0x2a1   : > { %922 = vmatpush.msra.mxu2 %v500_v41 }
 0x2a4   : > { %1169 = vmatpush.xpose.msk.msrb.mxu3 %vm717_vm13, %v714_v51 }
 0x2a6   : > { %v681_v56 = vpop.permute.xlu0 %680 }
 0x2a7   : > { %v693_v58 = vsel %vm692_vm14, %v624_v53, %v681_v56 }
 0x2a8   : > { %1170 = vmatpush.xpose.msk.msrb.mxu3 %vm717_vm13, %v713_v57 }
 0x2ab   : > { %1171 = vmatmul.msk.f32.vlgmr.msrb.gmra.mxu3 %vm717_vm13, %v693_v58 }
 0x2ae   : > { %v687_v10 = vpop.permute.xlu0 %686 }
 0x2af   : > { %v696_v11 = vsel %vm692_vm14, %v633_v7, %v687_v10  ;;  %v502_v7 = vld [vmem:[%s1860_s4] sm:$0xff]  ;;  %v503_v10 = vld [vmem:[%s1860_s4 + $0x8] sm:$0xff] }
 0x2b3   : > { %1172 = vmatmul.msk.f32.gmra.mxu3 %vm717_vm13, %v694_v40 }
 0x2bb   : > { %1173 = vmatmul.msk.f32.gmra.mxu3 %vm717_vm13, %v695_v3  ;;  %v499_v3 = vld [vmem:[%s1859_s3 + $0x8] sm:$0xff] }
 0x2bc   : > { %923 = vmatpush.msra.mxu2 %v499_v3 }
 0x2c3   : > { %1174 = vmatmul.msk.f32.gmra.mxu3 %vm717_vm13, %v696_v11  ;;  %v504_v11 = vld [vmem:[%s1860_s4 + $0x10] sm:$0xff] }
 0x32e   : > { %v759_v15 = vpop.f32.mrf.mxu3 }
 0x32f   : > { %v801_v31 = vadd.f32 %v800_v12, %v759_v15  ;;  %v505_v12 = vld [vmem:[%s1860_s4 + $0x18] sm:$0xff]  ;;  %v515_v15 = vld [vmem:[%s1863_s7 + $0x8] sm:$0xff] }
 0x331   : > { %v812_v33 = vsel %vm560_vm12, %v801_v31, -inf }
 0x336   : > { %v762_v17 = vpop.f32.mrf.mxu3 }
 0x337   : > { %v804_v18 = vadd.f32 %v803_v16, %v762_v17  ;;  %v498_v16 = vld [vmem:[%s1859_s3] sm:$0xff] }
 0x338   : > { %v514_v17 = vld [vmem:[%s1863_s7] sm:$0xff]  ;;  %924 = vmatpush.msra.mxu2 %v498_v16 }
 0x339   : > { %v815_v19 = vsel %vm560_vm12, %v804_v18, -inf }
 0x33a   : > { %816 = vmax.xlane.f32.xlu0 %v815_v19 }
 0x33e   : > { %v765_v21 = vpop.f32.mrf.mxu3 }
 0x33f   : > { %v807_v22 = vadd.f32 %v806_v20, %v765_v21 }
 0x341   : > { %v818_v23 = vsel %vm560_vm12, %v807_v22, -inf }
 0x342   : > { %819 = vmax.xlane.f32.xlu1 %v818_v23  ;;  %v518_v23 = vld [vmem:[%s1864_s8] sm:$0xff] }
 0x346   : > { %v768_v28 = vpop.f32.mrf.mxu3 }
 0x347   : > { %v810_v29 = vadd.f32 %v809_v26, %v768_v28 }
 0x349   : > { %v821_v30 = vsel %vm560_vm12, %v810_v29, -inf }
 0x34a   : > { %822 = vmax.xlane.f32.xlu2 %v821_v30  ;;  %v519_v30 = vld [vmem:[%s1864_s8 + $0x8] sm:$0xff] }
 0x352   : > { %813 = vmax.xlane.f32.xlu2 %v812_v33 }
 0x3ad   : > { %v817_v35 = vpop.xlane.xlu0 %816 }
 0x3ae   : > { %v825_v25 = vsub.f32 %v804_v18, %v817_v35 }
 0x3b0   : > { %v830_v36 = vmul.f32 1.442695, %v825_v25 }
 0x3b2   : > { %1269 = vpow2.f32 %v830_v36  ;;  %v520_v36 = vld [vmem:[%s1864_s8 + $0x10] sm:$0xff] }
 0x3b5   : > { %v820_v24 = vpop.xlane.xlu1 %819 }
 0x3b6   : > { %v826_v37 = vsub.f32 %v807_v22, %v820_v24  ;;  %v1386_v22 = vmov 0  }
 0x3b7   : > { %1258 = vset.pattern.permute.xlu0 %v1386_v22  ;;  %1259 = vset.pattern.permute.xlu2 %v1386_v22 }
 0x3b8   : > { %v1270_v39 = vpop.eup %1269  ;;  %v832_v42 = vmul.f32 1.442695, %v826_v37  ;;  %1260 = vset.pattern.permute.xlu1 %v1386_v22 }
 0x3b9   : > { %v839_v32 = vsel %vm560_vm12, %v1270_v39, 0.0 }
 0x3ba   : > { %1271 = vpow2.f32 %v832_v42  ;;  %840 = vadd.xlane.f32.xlu2 %v839_v32  ;;  %v521_v42 = vld [vmem:[%s1864_s8 + $0x18] sm:$0xff] }
 0x3bd   : > { %v823_v43 = vpop.xlane.xlu2 %822 }
 0x3be   : > { %v827_v44 = vsub.f32 %v810_v29, %v823_v43 }
 0x3c0   : > { %v1272_v45 = vpop.eup %1271  ;;  %v834_v46 = vmul.f32 1.442695, %v827_v44 }
 0x3c1   : > { %v842_v34 = vsel %vm560_vm12, %v1272_v45, 0.0 }
 0x3c2   : > { %1273 = vpow2.f32 %v834_v46  ;;  %843 = vadd.xlane.f32.xlu0 %v842_v34 }
 0x3c5   : > { %v814_v48 = vpop.xlane.xlu2 %813 }
 0x3c6   : > { %v824_v49 = vsub.f32 %v801_v31, %v814_v48 }
 0x3c8   : > { %v1274_v50 = vpop.eup %1273  ;;  %v828_v51 = vmul.f32 1.442695, %v824_v49 }
 0x3c9   : > { %v845_v52 = vsel %vm560_vm12, %v1274_v50, 0.0 }
 0x3ca   : > { %1275 = vpow2.f32 %v828_v51  ;;  %846 = vadd.xlane.f32.xlu1 %v845_v52 }
 0x3d0   : > { %v1276_v53 = vpop.eup %1275 }
 0x3d1   : > { %v836_v54 = vsel %vm560_vm12, %v1276_v53, 0.0 }
 0x3d2   : > { %837 = vadd.xlane.f32.xlu1 %v836_v54 }
 0x42d   : > { %v841_v56 = vpop.xlane.xlu2 %840 }
 0x435   : > { %v844_v55 = vpop.xlane.xlu0 %843 }
 0x436   : > { %1277 = vrcp.f32 %v844_v55 }
 0x43c   : > { %v1278_v58 = vpop.eup %1277 }
 0x43d   : > { %v847_v57 = vpop.xlane.xlu1 %846  ;;  %v854_v40 = vmul.f32 %v1278_v58, %v1272_v45 }
 0x43e   : > { %1279 = vrcp.f32 %v847_v57 }
 0x43f   : > { %1281 = vrcp.f32 %v841_v56 }
 0x444   : > { %v1280_v59 = vpop.eup %1279 }
 0x445   : > { %v838_v38 = vpop.xlane.xlu1 %837  ;;  %v855_v60 = vmul.f32 %v1280_v59, %v1274_v50  ;;  %v1282_v62 = vpop.eup %1281 }
 0x446   : > { %1283 = vrcp.f32 %v838_v38  ;;  %v853_v63 = vmul.f32 %v1282_v62, %v1270_v39 }
 0x447   : > { %880 = vmatpush.msrb.mxu1 %v855_v60 }
 0x449   : > { %881 = vmatpush.msrb.mxu1 %v854_v40 }
 0x44b   : > { %882 = vmatpush.msrb.mxu1 %v853_v63 }
 0x44c   : > { %v1284_v4 = vpop.eup %1283 }
 0x44d   : > { %v852_v5 = vmul.f32 %v1284_v4, %v1276_v53 }
 0x44f   : > { %883 = vmatpush.msrb.mxu1 %v852_v5 }
 0x450   : > { %1183 = vmatmul.msk.f32.vlgmr.msrb.gmra.mxu1 %vm560_vm12, %v502_v7 }
 0x451   : > { %1000 = vmatpush.bf16.msra.mxu1 %v1623_v47  ;;  %v517_v47 = vld [vmem:[%s1863_s7 + $0x18] sm:$0xff] }
 0x452   : > { %950 = vmatpush.msra.mxu3 %v517_v47 }
 0x455   : > { %1001 = vmatpush.bf16.msra.mxu1 %v1637_v61  ;;  %v516_v61 = vld [vmem:[%s1863_s7 + $0x10] sm:$0xff] }
 0x456   : > { %951 = vmatpush.msra.mxu3 %v516_v61 }
 0x458   : > { %1184 = vmatmul.msk.f32.gmra.mxu1 %vm560_vm12, %v503_v10  ;;  %952 = vmatpush.msra.mxu3 %v515_v15 }
 0x45a   : > { %953 = vmatpush.msra.mxu3 %v514_v17 }
 0x460   : > { %1185 = vmatmul.msk.f32.gmra.mxu1 %vm560_vm12, %v504_v11 }
 0x468   : > { %1186 = vmatmul.msk.f32.gmra.mxu1 %vm560_vm12, %v505_v12 }
 0x4cd   : > { %v885_v18 = vpop.f32.mrf.mxu1 }
 0x4ce   : > { %1187 = vmatmul.msk.f32.vlgmr.msra.gmra.mxu2 %vm560_vm12, %v885_v18  ;;  %1191 = vmatmul.msk.f32.vlgmr.msra.gmra.mxu3 %vm560_vm12, %v885_v18 }
 0x4d5   : > { %v888_v19 = vpop.f32.mrf.mxu1 }
 0x4d6   : > { %1188 = vmatmul.msk.f32.gmra.mxu2 %vm560_vm12, %v888_v19  ;;  %1192 = vmatmul.msk.f32.gmra.mxu3 %vm560_vm12, %v888_v19 }
 0x4dd   : > { %v891_v20 = vpop.f32.mrf.mxu1 }
 0x4de   : > { %1189 = vmatmul.msk.f32.gmra.mxu2 %vm560_vm12, %v891_v20  ;;  %1193 = vmatmul.msk.f32.gmra.mxu3 %vm560_vm12, %v891_v20 }
 0x4e5   : > { %v894_v21 = vpop.f32.mrf.mxu1 }
 0x4e6   : > { %1190 = vmatmul.msk.f32.gmra.mxu2 %vm560_vm12, %v894_v21  ;;  %1194 = vmatmul.msk.f32.gmra.mxu3 %vm560_vm12, %v894_v21 }
 0x551   : > { %v926_v26 = vpop.f32.mrf.mxu2  ;;  %v955_v28 = vpop.f32.mrf.mxu3 }
 0x552   : > { %v956_v29 = vadd.f32 %v955_v28, %v518_v23 }
 0x554   : > { %1023 = vperm.xlu0 %1258, %v956_v29  }
 0x559   : > { %v929_v31 = vpop.f32.mrf.mxu2  ;;  %v958_v33 = vpop.f32.mrf.mxu3 }
 0x55a   : > { %v967_v35 = vpack.c.bf16 %v929_v31, %v926_v26  ;;  %v959_v25 = vadd.f32 %v958_v33, %v519_v30 }
 0x55c   : > { %1195 = vmatmul.msk.bf16.vlgmr.msra.gmra.mxu0 %vm560_vm12, %v967_v35  ;;  %1197 = vmatmul.msk.bf16.vlgmr.msra.gmra.mxu1 %vm560_vm12, %v967_v35 }
 0x55d   : > { %1028 = vperm.xlu2 %1259, %v959_v25  }
 0x561   : > { %v932_v24 = vpop.f32.mrf.mxu2  ;;  %v961_v37 = vpop.f32.mrf.mxu3 }
 0x562   : > { %v962_v39 = vadd.f32 %v961_v37, %v520_v36 }
 0x564   : > { %1033 = vperm.xlu1 %1260, %v962_v39  }
 0x569   : > { %v935_v32 = vpop.f32.mrf.mxu2  ;;  %v964_v43 = vpop.f32.mrf.mxu3 }
 0x56a   : > { %v968_v44 = vpack.c.bf16 %v935_v32, %v932_v24  ;;  %v965_v45 = vadd.f32 %v964_v43, %v521_v42 }
 0x56c   : > { %1196 = vmatmul.msk.bf16.gmra.mxu0 %vm560_vm12, %v968_v44  ;;  %1198 = vmatmul.msk.bf16.gmra.mxu1 %vm560_vm12, %v968_v44 }
 0x56d   : > { %1038 = vperm.xlu2 %1259, %v965_v45  }
 0x5b7   : > { %v1029_v55 = vpop.permute.xlu2 %1028 }
 0x5c6   : > { %v1024_v50 = vpop.permute.xlu0 %1023 }
 0x5c7   : > { %v1039_v41 = vpop.permute.xlu2 %1038 }
 0x5d6   : > { %v1034_v62 = vpop.permute.xlu1 %1033 }
 0x5d9   : > { %v984_v46 = vpop.f32.mrf.mxu0  ;;  %v1003_v34 = vpop.f32.mrf.mxu1 }
 0x5da   : > { %v1013_v48 = vadd.f32 %v984_v46, %v1539_v2  ;;  %v1014_v49 = vadd.f32 %v1003_v34, %v1547_v6 }
 0x5dc   : > { %v1041_v51 = vadd.f32 %v1024_v50, %v1013_v48  ;;  %v1042_v52 = vadd.f32 %v1024_v50, %v1014_v49 }
 0x5de   : > { %1049 = vst [vmem:[%s1806_s18] sm:$0xff] %v1041_v51 }
 0x5df   : > { %1050 = vst [vmem:[%s1806_s18 + $0x8] sm:$0xff] %v1042_v52 }
 0x5e1   : > { %v986_v53 = vpop.f32.mrf.mxu0  ;;  %v1005_v54 = vpop.f32.mrf.mxu1 }
 0x5e2   : > { %v1015_v2 = vadd.f32 %v986_v53, %v1559_v13  ;;  %v1016_v6 = vadd.f32 %v1005_v54, %v1561_v14 }
 0x5e4   : > { %v1043_v56 = vadd.f32 %v1029_v55, %v1015_v2  ;;  %v1044_v57 = vadd.f32 %v1029_v55, %v1016_v6 }
 0x5e6   : > { %1051 = vst [vmem:[%s1806_s18 + $0x10] sm:$0xff] %v1043_v56 }
 0x5e7   : > { %1052 = vst [vmem:[%s1806_s18 + $0x18] sm:$0xff] %v1044_v57 }
 0x5e9   : > { %v989_v58 = vpop.f32.mrf.mxu0  ;;  %v1008_v59 = vpop.f32.mrf.mxu1 }
 0x5ea   : > { %v1017_v38 = vadd.f32 %v989_v58, %v1535_v0  ;;  %v1018_v60 = vadd.f32 %v1008_v59, %v1537_v1 }
 0x5ec   : > { %v1045_v40 = vadd.f32 %v1034_v62, %v1017_v38  ;;  %v1046_v13 = vadd.f32 %v1034_v62, %v1018_v60 }
 0x5ee   : > { %1053 = vst [vmem:[%s1806_s18 + $0x20] sm:$0xff] %v1045_v40 }
 0x5ef   : > { %1054 = vst [vmem:[%s1806_s18 + $0x28] sm:$0xff] %v1046_v13 }
 0x5f1   : > { %v991_v14 = vpop.f32.mrf.mxu0  ;;  %v1010_v27 = vpop.f32.mrf.mxu1 }
 0x5f2   : > { %v1019_v0 = vadd.f32 %v991_v14, %v1551_v8  ;;  %v1020_v1 = vadd.f32 %v1010_v27, %v1553_v9 }
 0x5f4   : > { %v1047_v63 = vadd.f32 %v1039_v41, %v1019_v0  ;;  %v1048_v3 = vadd.f32 %v1039_v41, %v1020_v1 }
 0x5f6   : > { %1055 = vst [vmem:[%s1806_s18 + $0x30] sm:$0xff] %v1047_v63 }
 0x5f7   : > { %1056 = vst [vmem:[%s1806_s18 + $0x38] sm:$0xff] %v1048_v3 }
 0x5f8   : > { %1342 = shalt.err (!%p1339_p4)
}
 0x5f9   : > { %s1387_s14 = smov 256   ;;  %s1388_s18 = smov 16  }
 0x5fa   : > { %1208 = dma.vmem_to_hbm [thread:$0]  (%p1489_p11), %s1071_s17, 1024, %s1073_s25, %s1058_s13, %s1387_s14, %s1387_s14, %s1388_s18  }
 0x5fb PF: > { %s1087_s11 = sand.u32 1, %s1369_s30   ;;  %p1877_p7 = scmp.ge.s32.totalorder %s1381_s12, 2 }
 0x5fc   : > { %s1088_s20 = scalar_lea.sflag [#allocation4], %s1087_s11 }
 0x5fd   : > { %p1215_p5 = pnand %p1877_p7, %p1493_p12 }
 0x5ff   : > { %p1216_p8 = pneg %p1215_p5 }
 0x601   : > { %1364 = dma.done.wait (%p1216_p8), %s1088_s20, 1024  }
 0x602   : > { %1366 = vsyncadd (%p1216_p8), %s1088_s20, 4294966272  ;;  %s1878_s12 = sld [smem:[#allocation9_spill]]  ;;  %s1881_s30 = smov %s1373_s10 }
 0x603   : > { %s1879_s29 = sld [smem:[#allocation8_spill]] }
 0x604   : > { %s1880_s11 = sld [smem:[#allocation10_spill]] }
 0x608   : > { %p22_p10 = scmp.ge.s32.totalorder %s1878_s12, 4  }
 0x609   : > { %s1882_s10 = smov %s1879_s29 }
 0x60a   :  { %24 = sbr.rel (!%p22_p10) target bundleno = 5 (0x5), region = 101 }
 0x60f   :  { %1094 = vsyncpa [#allocation3], 1 }
 0x610   :  { %1096 = vsyncpa [#allocation3 + $0x1], 1 }
 0x611   :  { %1097 = vsyncpa [#allocation4], 1 }
 0x612   :  { %1099 = vsyncpa [#allocation4 + $0x1], 1 }

</bundles_post_ra>
